<compile_context>
chip_gen: v7x
topology: tpu7x:2x2x1
jax: 0.10.0
libtpu: 0.0.40
codegen_flags: <defaults>
</compile_context>

<pallas_src>
import jax
import jax.numpy as jnp
from jax import lax
from jax.experimental import pallas as pl
from jax.experimental.pallas import tpu as pltpu

LANES = 128
MAX_CHUNK_ROWS = 1024            # rows per inner accumulation step (<=512 KiB f32)
DEFAULT_BLOCK_ROWS = 8192        # 4 MiB per f32 input tile
VMEM_LIMIT_BYTES = 32 * 1024 * 1024


def _cdiv(a: int, b: int) -> int:
    return -(-a // b)


def _round_up(a: int, b: int) -> int:
    return _cdiv(a, b) * b


def _sublane(dtype) -> int:
    """Second-to-last-dim tiling granularity for a packed dtype (8/16/32)."""
    return max(8, 32 // jnp.dtype(dtype).itemsize)


def _prep_2d(a, sub_rows: int):
    """Flatten `a` into a lane-dense (rows, 128) view.

    Zero-copy (a pure row-major reshape) whenever a.size is a multiple of 128
    and there are at least `sub_rows` rows; otherwise the tail is zero-padded
    (a copy, but only for misaligned or tiny inputs).  Zero padding on BOTH
    operands contributes exactly 0 to the SSE.
    """
    total = a.size
    flat = a.reshape(-1)
    rows = total // LANES
    if total % LANES == 0 and rows >= sub_rows:
        return flat.reshape(rows, LANES)
    # TODO(synk): a fully zero-copy path for element counts that are not a
    # multiple of 128 would need manual byte-level DMA from a flat HBM ref.
    padded_rows = max(_round_up(_cdiv(total, LANES), sub_rows), sub_rows)
    flat = jnp.pad(flat, (0, padded_rows * LANES - total))
    return flat.reshape(padded_rows, LANES)


def _pick_tiling(rows: int, sub: int, max_block_rows: int):
    """Choose (block_rows, chunk_rows, grid_n).

    block_rows is a multiple of the sublane granularity, capped so the grid
    has >= 2 steps whenever there are >= 2*sub rows (lets the "parallel" axis
    shard across both v7x TensorCores), and a multiple of MAX_CHUNK_ROWS once
    it exceeds it (so the in-kernel fori_loop slices evenly).
    """
    if rows < 2 * sub:
        br = sub
    else:
        half = _round_up(_cdiv(rows, 2), sub)         # keeps grid_n >= 2
        br = min(_round_up(max_block_rows, sub), half)
    if br > MAX_CHUNK_ROWS:
        br = _round_up(br, MAX_CHUNK_ROWS)
        chunk = MAX_CHUNK_ROWS
    else:
        chunk = br
    return br, chunk, _cdiv(rows, br)


def _make_kernel(rows: int, br: int, chunk: int):
    """SSE-partial kernel over one (br, 128) tile of input and target.

    Emits an (8,128) f32 partial sum per grid step (pure VPU vreg adds, no
    cross-lane reduce, no serial accumulator).  If the last grid step
    overruns the true row count, the out-of-bounds (garbage) rows are masked
    inside the kernel instead of padding the operands in HBM.
    """
    nchunks = br // chunk
    needs_mask = (rows % br) != 0      # static: only the last block can be partial

    def chunk_sse(x, t, i, c):
        d = x.astype(jnp.float32) - t.astype(jnp.float32)
        dd = d * d
        if needs_mask:
            valid = rows - i * br - c * chunk          # valid rows in this chunk
            row_id = lax.broadcasted_iota(jnp.int32, dd.shape, 0)
            dd = jnp.where(row_id < valid, dd, 0.0)
        # (chunk,128) -> (chunk//8, 8, 128); summing the leading axis is
        # elementwise vreg addition (VALU only, no XLU cross-lane reduce).
        return jnp.sum(dd.reshape(chunk // 8, 8, LANES), axis=0)

    def kernel(x_ref, t_ref, out_ref):
        i = pl.program_id(0)
        if nchunks == 1:
            out_ref[0] = chunk_sse(x_ref[...], t_ref[...], i, 0)
        else:
            def body(c, acc):
                start = pl.multiple_of(c * chunk, chunk)
                xs = x_ref[pl.ds(start, chunk), :]
                ts = t_ref[pl.ds(start, chunk), :]
                return acc + chunk_sse(xs, ts, i, c)
            out_ref[0] = lax.fori_loop(0, nchunks, body,
                                       jnp.zeros((8, LANES), jnp.float32),
                                       unroll=True)

    return kernel


def _mse_from_2d(x2, t2, total: int, *, block_rows: int = DEFAULT_BLOCK_ROWS):
    """MSE between two identically shaped (rows,128) arrays, dividing by
    `total` (the true, unpadded element count)."""
    assert x2.shape == t2.shape and x2.ndim == 2 and x2.shape[1] == LANES
    rows = x2.shape[0]
    sub = max(_sublane(x2.dtype), _sublane(t2.dtype))
    br, chunk, grid_n = _pick_tiling(rows, sub, block_rows)

    in_bytes = x2.size * x2.dtype.itemsize + t2.size * t2.dtype.itemsize
    out_bytes = grid_n * 8 * LANES * 4

    partials = pl.pallas_call(
        _make_kernel(rows, br, chunk),
        out_shape=jax.ShapeDtypeStruct((grid_n, 8, LANES), jnp.float32),
        grid_spec=pltpu.PrefetchScalarGridSpec(
            num_scalar_prefetch=0,
            grid=(grid_n,),
            in_specs=[
                pl.BlockSpec((br, LANES), lambda i: (i, 0)),
                pl.BlockSpec((br, LANES), lambda i: (i, 0)),
            ],
            out_specs=pl.BlockSpec((1, 8, LANES), lambda i: (i, 0, 0)),
        ),
        compiler_params=pltpu.CompilerParams(
            # Independent grid steps: lets v7x shard across both TensorCores.
            dimension_semantics=("parallel",),
            vmem_limit_bytes=VMEM_LIMIT_BYTES,
        ),
        cost_estimate=pl.CostEstimate(
            flops=3 * rows * LANES,        # sub + mul + add per element
            transcendentals=0,
            bytes_accessed=in_bytes + out_bytes,
        ),
    )(x2, t2)

    # Tiny finishing reduction (grid_n * 1024 floats) + mean in the wrapper.
    return jnp.sum(partials) / jnp.float32(total)


def content_loss(x, target, *, block_rows: int = DEFAULT_BLOCK_ROWS):
    """Functional form: returns (input passthrough, mse loss scalar)."""
    assert x.shape == target.shape, "input/target shape mismatch"
    sub = max(_sublane(x.dtype), _sublane(target.dtype))
    x2 = _prep_2d(x, sub)
    t2 = _prep_2d(target, sub)
    return x, _mse_from_2d(x2, t2, x.size, block_rows=block_rows)


class ContentLoss:
    """Pallas analogue of the PyTorch module: forward(input) computes
    self.loss = mse_loss(input, fixed target) and returns input unchanged."""

    def __init__(self, target, *, block_rows: int = DEFAULT_BLOCK_ROWS):
        self.target = lax.stop_gradient(target)            # target.detach()
        self._block_rows = block_rows
        self._t2_cache = {}                                 # sublane -> 2-D target
        self._get_t2(_sublane(self.target.dtype))           # hoist target prep
        self.loss = None

    def _get_t2(self, sub: int):
        if sub not in self._t2_cache:
            self._t2_cache[sub] = _prep_2d(self.target, sub)
        return self._t2_cache[sub]

    def __call__(self, x):
        assert x.shape == self.target.shape, "ContentLoss: shape mismatch"
        sub = max(_sublane(x.dtype), _sublane(self.target.dtype))
        x2 = _prep_2d(x, sub)
        t2 = self._get_t2(sub)
        self.loss = _mse_from_2d(x2, t2, self.target.size,
                                 block_rows=self._block_rows)
        return x                                            # pass-through


if __name__ == "__main__":
    key = jax.random.PRNGKey(0)
    ks = jax.random.split(key, 10)

    def check(x, t, rtol=1e-5, atol=1e-6):
        crit = ContentLoss(t)
        out = crit(x)
        out, loss = jax.block_until_ready((out, crit.loss))
        ref = jnp.mean((x.astype(jnp.float32) - t.astype(jnp.float32)) ** 2)
        assert out.shape == x.shape and jnp.allclose(out, x), "pass-through mismatch"
        assert jnp.allclose(loss, ref, rtol=rtol, atol=atol), f"{loss} vs {ref}"

    # 1) Canonical small feature map: 2048 elements (multiple of 128)
    #    -> fully zero-copy path, grid_n = 2, no masking.
    shape = (2, 4, 16, 16)
    check(jax.random.normal(ks[0], shape, jnp.float32),
          jax.random.normal(ks[1], shape, jnp.float32))

    # 2) Element count NOT a multiple of 128 -> minimal zero-pad fallback.
    shape = (2, 3, 10, 10)
    check(jax.random.normal(ks[2], shape, jnp.float32),
          jax.random.normal(ks[3], shape, jnp.float32))

    # 3) 36 rows of 128 -> partial last block, exercises in-kernel tail masking.
    shape = (3, 8, 8, 24)
    check(jax.random.normal(ks[4], shape, jnp.float32),
          jax.random.normal(ks[5], shape, jnp.float32))

    # 4) 3200 rows -> exercises the chunked fori_loop accumulation, masking,
    #    and the 2-step "parallel" grid.
    shape = (4, 64, 40, 40)
    check(jax.random.normal(ks[6], shape, jnp.float32),
          jax.random.normal(ks[7], shape, jnp.float32),
          rtol=1e-4)

    # 5) bf16 inputs (HBM-bound kernel -> half the bytes), sublane=16 path.
    shape = (2, 4, 16, 16)
    check(jax.random.normal(ks[8], shape, jnp.float32).astype(jnp.bfloat16),
          jax.random.normal(ks[9], shape, jnp.float32).astype(jnp.bfloat16))

    print("KERNEL_OK")
</pallas_src>

<mosaic_0001>
module attributes {stable_mosaic.version = 11 : i64} {
  func.func @kernel(%arg0: i32, %arg1: memref<8x128xf32, #tpu.memory_space<vmem>>, %arg2: memref<8x128xf32, #tpu.memory_space<vmem>>, %arg3: memref<1x8x128xf32, #tpu.memory_space<vmem>>) attributes {dimension_semantics = [#tpu.dimension_semantics<parallel>], iteration_bounds = array<i64: 2>, scalar_prefetch = 0 : i64, scratch_operands = 0 : i64, tpu.core_type = #tpu.core_type<tc>, window_params = [{transform_indices = @transform_0, window_bounds = array<i64: 8, 128>}, {transform_indices = @transform_1, window_bounds = array<i64: 8, 128>}, {transform_indices = @transform_2, window_bounds = array<i64: 1, 8, 128>}]} {
    %c0 = arith.constant 0 : index
    %c0_0 = arith.constant 0 : index
    %0 = vector.load %arg1[%c0, %c0_0] : memref<8x128xf32, #tpu.memory_space<vmem>>, vector<8x128xf32>
    %c0_1 = arith.constant 0 : index
    %c0_2 = arith.constant 0 : index
    %1 = vector.load %arg2[%c0_1, %c0_2] : memref<8x128xf32, #tpu.memory_space<vmem>>, vector<8x128xf32>
    %2 = arith.subf %0, %1 : vector<8x128xf32>
    %3 = arith.mulf %2, %2 : vector<8x128xf32>
    %4 = vector.shape_cast %3 : vector<8x128xf32> to vector<1x8x128xf32>
    %cst = arith.constant dense<0.000000e+00> : vector<8x128xf32>
    %5 = vector.multi_reduction <add>, %4, %cst [0] : vector<1x8x128xf32> to vector<8x128xf32>
    %c0_3 = arith.constant 0 : index
    %c0_4 = arith.constant 0 : index
    %c0_5 = arith.constant 0 : index
    %6 = vector.load %arg3[%c0_3, %c0_4, %c0_5] : memref<1x8x128xf32, #tpu.memory_space<vmem>>, vector<1x8x128xf32>
    %7 = vector.shape_cast %6 : vector<1x8x128xf32> to vector<8x128xf32>
    %8 = vector.shape_cast %5 : vector<8x128xf32> to vector<1x8x128xf32>
    tpu.vector_store %arg3[%c0_3, %c0_4, %c0_5], %8 {strides = array<i32>} : memref<1x8x128xf32, #tpu.memory_space<vmem>>, vector<1x8x128xf32>,
    return
  }
  func.func @transform_0(%arg0: i32) -> (i32, i32) {
    %c0_i32 = arith.constant 0 : i32
    %c0_i32_0 = arith.constant 0 : i32
    return %arg0, %c0_i32 : i32, i32
  }
  func.func @transform_1(%arg0: i32) -> (i32, i32) {
    %c0_i32 = arith.constant 0 : i32
    %c0_i32_0 = arith.constant 0 : i32
    return %arg0, %c0_i32 : i32, i32
  }
  func.func @transform_2(%arg0: i32) -> (i32, i32, i32) {
    %c0_i32 = arith.constant 0 : i32
    %c0_i32_0 = arith.constant 0 : i32
    %c0_i32_1 = arith.constant 0 : i32
    return %arg0, %c0_i32, %c0_i32_0 : i32, i32, i32
  }
}

</mosaic_0001>

<bundles_post_ra>
// kernel: tpu_custom_call.1
= control target key start
LH: loop header
LB: loop body
LE: loop exit
PB: predicated region body
PF: predicated region fallthrough
CT: control target
= control target key end

     0   :  { %7 = vsyncpa [#allocation3], 0  ;;  %s734_s0 = inlined_call_operand.hbm [shape: f32[16,128], index: 0, kind: input, shape index: {}]   ;;  %s735_s1 = inlined_call_operand.hbm [shape: f32[16,128], index: 1, kind: input, shape index: {}]   ;;  %s736_s2 = inlined_call_operand.hbm [shape: f32[2,8,128], index: 2, kind: output, shape index: {}]  }
   0x1   :  { %9 = vsyncpa [#allocation3 + $0x1], 0 }
   0x2   :  { %10 = vsyncpa [#allocation6], 0 }
   0x3   :  { %12 = vsyncpa [#allocation6 + $0x1], 0 }
   0x4   :  { %13 = vsyncpa [#allocation4], 0 }
   0x5   :  { %15 = vsyncpa [#allocation4 + $0x1], 0  ;;  %s525_s9 = smov 0   ;;  %s527_s10 = smov 0  }
   0x6   :  { %s529_s11 = smov 0   ;;  %s531_s12 = smov 0  }
   0x7 LB: > { %s546_s13 = sadd.s32 4294967295, %s505_s12   ;;  %s309_s14 = sadd.s32 4294967294, %s505_s12   ;;  %s505_s12 = sphi %s531_s12, %s755_s12   ;;  %s501_s11 = sphi %s529_s11, %s754_s11   ;;  %s497_s10 = sphi %s527_s10, %s753_s10   ;;  %s493_s9 = sphi %s525_s9, %s752_s9  }
   0x8   : > { %s550_s15 = sadd.s32 1, %s505_s12   ;;  %s28_s16 = sadd.s32 1, %s501_s11 }
   0x9   : > { %s25_s17 = ssub.s32 %s505_s12, %s550_s15  ;;  %p35_p0 = scmp.ne.s32.totalorder %s501_s11, %s497_s10 }
   0xa   : > { %p26_p1 = scmp.eq.s32.totalorder %s25_s17, 0  ;;  %p36_p2 = scmp.eq.s32.totalorder %s505_s12, 0 }
   0xb   : > { %p41_p3 = scmp.ne.s32.totalorder %s497_s10, %s493_s9  ;;  %p42_p4 = scmp.eq.s32.totalorder %s546_s13, 0 }
   0xc   : > { %s562_s18 = scalar_select %p26_p1, %s501_s11, %s28_s16  }
   0xd   : > { %p564_p5 = por %p36_p2, %p35_p0  ;;  %p568_p6 = por %p42_p4, %p41_p3 }
   0xe   : > { %p91_p7 = scmp.eq.s32.totalorder %s546_s13, 1  ;;  %p97_p8 = scmp.eq.s32.totalorder %s309_s14, 1 }
   0xf   : > { %s740_s20 = scalar_select %p568_p6, 1, 0 }
  0x10   : > { %p341_p10 = scmp.lt.s32.totalorder %s505_s12, 2  ;;  %p575_p11 = por %p91_p7, %p35_p0 }
  0x11   : > { %p579_p12 = por %p97_p8, %p41_p3  ;;  %s584_s23 = sand.u32 1, %s501_s11  }
  0x12   : > { %s741_s21 = scalar_select %p575_p11, 1, 0 }
  0x13   : > { %s742_s22 = scalar_select %p579_p12, 1, 0 }
  0x14   : > { %s313_s24 = sshll.u32 %s505_s12, 7  ;;  %s312_s25 = sshll.u32 %s584_s23, 3 }
  0x15   : > { %s593_s28 = scalar_lea.hbm %s734_s0, %s313_s24  ;;  %s121_s29 = scalar_lea.vmem [#allocation2], %s312_s25 }
  0x16   : > { %s128_s30 = sshll.u32 %s121_s29, 4  ;;  %p599_p13 = pnand %p341_p10, %p564_p5  ;;  %s603_s30 = int_to_ptr.vmem [resolvable:$true] %s128_s30 }
  0x17   : > { %s118_s4 = scalar_lea.sflag [#allocation3], %s584_s23  ;;  %s375_s5 = scalar_lea.hbm %s593_s28, 128 }
  0x18   : > { %p376_p2 = scmp.ne.s32.totalorder %s593_s28, %s375_s5  ;;  %p377_p3 = pneg %p599_p13 }
  0x19   : > { %s380_s8 = scalar_lea.hbm %s734_s0, 256  ;;  %p381_p5 = scmp.lt.u32.totalorder %s593_s28, %s734_s0 }
  0x1a   : > { %p378_p4 = pnand %p377_p3, %p376_p2  ;;  %p382_p8 = scmp.lt.u32.totalorder %s380_s8, %s375_s5 }
  0x1b   : > { %p384_p9 = scmp.lt.u32.totalorder %s375_s5, %s593_s28 }
  0x1c   : > { %p379_p7 = pneg %p378_p4  ;;  %p383_p10 = por %p382_p8, %p381_p5 }
  0x1e   : > { %p385_p0 = por %p384_p9, %p383_p10 }
  0x20   : > { %p386_p1 = pnand %p385_p0, %p379_p7 }
  0x22   : > { %389 = shalt.err (!%p386_p1)
}
  0x23   : > { %s390_s17 = scalar_lea.vmem %s603_s30, 128  ;;  %s507_s19 = smov [#allocation2]  }
  0x24   : > { %p391_p2 = scmp.ne.s32.totalorder %s603_s30, %s390_s17  ;;  %s395_s26 = sshll.u32 %s507_s19, 4  ;;  %s396_s26 = int_to_ptr.vmem [resolvable:$false] %s395_s26 }
  0x25   : > { %s397_s27 = scalar_lea.vmem %s396_s26, 256  ;;  %p398_p11 = scmp.lt.s32.totalorder %s603_s30, %s396_s26 }
  0x26   : > { %p393_p4 = pnand %p391_p2, %p377_p3  ;;  %p399_p5 = scmp.lt.s32.totalorder %s397_s27, %s390_s17 }
  0x28   : > { %p394_p12 = pneg %p393_p4  ;;  %p400_p8 = por %p399_p5, %p398_p11 }
  0x2a   : > { %p401_p9 = pnand %p400_p8, %p394_p12 }
  0x2c   : > { %404 = shalt.err (!%p401_p9)
}
  0x2d   : > { %333 = dma.hbm_to_vmem [thread:$0]  (!%p599_p13), %s593_s28, 128, %s603_s30, %s118_s4  }
  0x2e   : > { %p744_p0 = scmp.lt.s32.totalorder %s505_s12, 3  ;;  %p745_p1 = scmp.ge.s32.totalorder %s505_s12, 1 }
  0x2f   : > { %s646_s7 = scalar_lea.hbm %s735_s1, %s313_s24  ;;  %s139_s8 = scalar_lea.vmem [#allocation5], %s312_s25 }
  0x30   : > { %p637_p7 = pnand %p745_p1, %p744_p0  ;;  %s146_s14 = sshll.u32 %s139_s8, 4  ;;  %s147_s14 = int_to_ptr.vmem [resolvable:$true] %s146_s14 }
  0x31   : > { %s136_s28 = scalar_lea.sflag [#allocation6], %s584_s23  ;;  %s405_s30 = scalar_lea.hbm %s646_s7, 128 }
  0x32   : > { %s746_s29 = scalar_select %p637_p7, 1, 0 }
  0x33   : > { %p406_p11 = scmp.ne.s32.totalorder %s646_s7, %s405_s30  ;;  %s410_s24 = scalar_lea.hbm %s735_s1, 256 }
  0x34   : > { %p411_p2 = scmp.lt.u32.totalorder %s646_s7, %s735_s1  ;;  %p412_p4 = scmp.lt.u32.totalorder %s410_s24, %s405_s30 }
  0x35   : > { %p408_p12 = pnand %p406_p11, %p377_p3  ;;  %p414_p8 = scmp.lt.u32.totalorder %s405_s30, %s646_s7 }
  0x36   : > { %p413_p5 = por %p412_p4, %p411_p2 }
  0x37   : > { %p409_p10 = pneg %p408_p12 }
  0x38   : > { %p415_p9 = por %p414_p8, %p413_p5 }
  0x3a   : > { %p416_p0 = pnand %p415_p9, %p409_p10 }
  0x3c   : > { %419 = shalt.err (!%p416_p0)
}
  0x3d   : > { %s420_s23 = scalar_lea.vmem %s147_s14, 128  ;;  %s508_s25 = smov [#allocation5]  }
  0x3e   : > { %p421_p1 = scmp.ne.s32.totalorder %s147_s14, %s420_s23  ;;  %s425_s26 = sshll.u32 %s508_s25, 4  ;;  %s426_s26 = int_to_ptr.vmem [resolvable:$false] %s425_s26 }
  0x3f   : > { %s427_s27 = scalar_lea.vmem %s426_s26, 256  ;;  %p428_p6 = scmp.lt.s32.totalorder %s147_s14, %s426_s26 }
  0x40   : > { %p423_p11 = pnand %p421_p1, %p377_p3  ;;  %p429_p7 = scmp.lt.s32.totalorder %s427_s27, %s420_s23 }
  0x42   : > { %p424_p12 = pneg %p423_p11  ;;  %p430_p2 = por %p429_p7, %p428_p6 }
  0x44   : > { %p431_p4 = pnand %p430_p2, %p424_p12 }
  0x46   : > { %434 = shalt.err (!%p431_p4)
}
  0x47   : > { %336 = dma.hbm_to_vmem [thread:$0]  (!%p599_p13), %s646_s7, 128, %s147_s14, %s136_s28  }
  0x48   : > { %p747_p10 = scmp.ne.s32.totalorder %s746_s29, 0 }
  0x49   : > { %s673_s5 = sand.u32 (!%p747_p10), 1, %s497_s10   ;;  %p748_p3 = scmp.ne.s32.totalorder (!%p747_p10), %s740_s20, 0 }
  0x4a   : > { %155 = sbr.rel (%p747_p10) target bundleno = 110 (0x6e), region = 28  ;;  %s317_s6 = sshll.u32 (!%p747_p10), %s673_s5, 3 }
  0x4b   : > { %s158_s8 = scalar_lea.sflag (!%p747_p10), [#allocation3], %s673_s5  ;;  %s161_s30 = scalar_lea.vmem (!%p747_p10), [#allocation2], %s317_s6 }
  0x51   : > { %480 = dma.done.wait (%p748_p3), %s158_s8, 128  }
  0x52   : > { %482 = vsyncadd (%p748_p3), %s158_s8, 4294967168  ;;  %s167_s3 = scalar_lea.sflag [#allocation6], %s673_s5  ;;  %s170_s7 = scalar_lea.vmem [#allocation5], %s317_s6 }
  0x53   : > { %484 = dma.done.wait (%p748_p3), %s167_s3, 128  }
  0x54   : > { %486 = vsyncadd (%p748_p3), %s167_s3, 4294967168  ;;  %v196_v0 = vld [vmem:[%s161_s30] sm:$0xff]  ;;  %v197_v1 = vld [vmem:[%s170_s7] sm:$0xff]  ;;  %s195_s29 = scalar_lea.vmem [#allocation7], %s317_s6  ;;  %s321_s28 = sshll.u32 %s546_s13, 7 }
  0x55   : > { %s216_s14 = sshll.u32 %s195_s29, 4  ;;  %v198_v2 = vsub.f32 %v196_v0, %v197_v1  ;;  %s692_s20 = scalar_lea.hbm %s736_s2, %s321_s28  ;;  %s687_s14 = int_to_ptr.vmem [resolvable:$true] %s216_s14 }
  0x56   : > { %s203_s24 = scalar_lea.sflag [#allocation4], %s673_s5  ;;  %s435_s17 = scalar_lea.vmem %s687_s14, 128 }
  0x57   : > { %v199_v3 = vmul.f32 %v198_v2, %v198_v2  ;;  %p436_p6 = scmp.ne.s32.totalorder %s687_s14, %s435_s17  ;;  %p749_p13 = scmp.ne.s32.totalorder %s741_s21, 0 }
  0x58   : > { %s509_s13 = smov [#allocation7]  }
  0x59   : > { %201 = vst [vmem:[%s195_s29] sm:$0xff] %v199_v3  ;;  %p437_p7 = pnand %p436_p6, %p749_p13  ;;  %s439_s19 = sshll.u32 %s509_s13, 4  ;;  %s440_s19 = int_to_ptr.vmem [resolvable:$false] %s439_s19 }
  0x5a   : > { %s441_s23 = scalar_lea.vmem %s440_s19, 256  ;;  %p442_p8 = scmp.lt.s32.totalorder %s687_s14, %s440_s19 }
  0x5b   : > { %p438_p5 = pneg %p437_p7  ;;  %p443_p9 = scmp.lt.s32.totalorder %s441_s23, %s435_s17 }
  0x5d   : > { %p444_p0 = por %p443_p9, %p442_p8 }
  0x5f   : > { %p445_p1 = pnand %p444_p0, %p438_p5 }
  0x61   : > { %448 = shalt.err (!%p445_p1)
}
  0x62   : > { %s449_s25 = scalar_lea.hbm %s692_s20, 128  ;;  %s453_s5 = scalar_lea.hbm %s736_s2, 256 }
  0x63   : > { %p450_p11 = scmp.ne.s32.totalorder %s692_s20, %s449_s25  ;;  %p454_p4 = scmp.lt.u32.totalorder %s692_s20, %s736_s2 }
  0x64   : > { %p455_p10 = scmp.lt.u32.totalorder %s453_s5, %s449_s25  ;;  %p457_p6 = scmp.lt.u32.totalorder %s449_s25, %s692_s20 }
  0x65   : > { %p451_p12 = pnand %p450_p11, %p749_p13 }
  0x66   : > { %p456_p3 = por %p455_p10, %p454_p4 }
  0x67   : > { %p452_p2 = pneg %p451_p12 }
  0x68   : > { %p458_p7 = por %p457_p6, %p456_p3 }
  0x6a   : > { %p459_p5 = pnand %p458_p7, %p452_p2 }
  0x6c   : > { %462 = shalt.err (!%p459_p5)
}
  0x6d   : > { %328 = dma.vmem_to_hbm [thread:$0]  (%p749_p13), %s687_s14, 128, %s692_s20, %s203_s24  }
  0x6e PF: > { %s228_s30 = sand.u32 1, %s493_s9   ;;  %p750_p8 = scmp.ne.s32.totalorder %s742_s22, 0 }
  0x6f   : > { %p751_p9 = scmp.ge.s32.totalorder %s505_s12, 2  ;;  %s229_s3 = scalar_lea.sflag [#allocation4], %s228_s30 }
  0x71   : > { %p338_p0 = pnand %p751_p9, %p750_p8 }
  0x73   : > { %488 = dma.done.wait (!%p338_p0), %s229_s3, 128  }
  0x74   : > { %490 = vsyncadd (!%p338_p0), %s229_s3, 4294967168  ;;  %p18_p1 = scmp.ge.s32.totalorder %s550_s15, 4   ;;  %s752_s9 = smov %s497_s10 }
  0x75   : > { %s753_s10 = smov %s501_s11  ;;  %s754_s11 = smov %s562_s18 }
  0x76   : > { %s755_s12 = smov %s550_s15  ;;  %20 = sbr.rel (!%p18_p1) target bundleno = 7 (0x7), region = 86 }
  0x7d   :  { %234 = vsyncpa [#allocation3], 1 }
  0x7e   :  { %236 = vsyncpa [#allocation3 + $0x1], 1 }
  0x7f   :  { %237 = vsyncpa [#allocation6], 1 }
  0x80   :  { %239 = vsyncpa [#allocation6 + $0x1], 1 }
  0x81   :  { %240 = vsyncpa [#allocation4], 1 }
  0x82   :  { %242 = vsyncpa [#allocation4 + $0x1], 1 }

</bundles_post_ra>
